<compile_context>
chip_gen: v7x
topology: tpu7x:2x2x1
jax: 0.10.0
libtpu: 0.0.40
codegen_flags: <defaults>
</compile_context>

<pallas_src>
import jax
import jax.numpy as jnp
from jax import lax
from jax.experimental import pallas as pl
from jax.experimental.pallas import tpu as pltpu

_EPS = 1e-5
_LANE = 128                   # lane-dense last dim (one full vreg width)
_BLOCK_ROWS = 8192            # 8192 x 128 x 4B = 4 MiB f32 streaming block
_FUSED_MAX_BYTES = 8 << 20    # fused VMEM-resident fast path below this size
_VMEM_LIMIT = 48 << 20        # <= v7x's 64 MiB physical VMEM with headroom


# ---------------------------------------------------------------------------
# Fused single-pass kernel: max(|x|) + scale in one VMEM-resident step.
# params_ref (SMEM, (1,2) f32) = [new_loudness, apply_flag].
# ---------------------------------------------------------------------------
def _fused_kernel(params_ref, x_ref, o_ref):
    x = x_ref[...].astype(jnp.float32)
    max_abs = jnp.max(jnp.abs(x))
    loud = params_ref[0, 0]
    apply = params_ref[0, 1]
    scale = jnp.where(apply > 0.5,
                      loud / (max_abs + jnp.float32(_EPS)),
                      jnp.float32(1.0))
    o_ref[...] = (x * scale).astype(o_ref.dtype)


def _make_stream_kernel(rows: int, block_rows: int, needs_mask: bool):
    """Merged two-phase streaming kernel, grid = (2, NB).

    phase 0: per-block |x| max into a (1, LANE) VMEM accumulator; scalar scale
             written to SMEM scratch at the last phase-0 step.
    phase 1: multiply every block by the SMEM scalar.
    """

    def kernel(params_ref, x_ref, o_ref, acc_ref, scale_ref):
        p = pl.program_id(0)
        i = pl.program_id(1)
        nb = pl.num_programs(1)

        @pl.when((p == 0) & (i == 0))
        def _():
            acc_ref[...] = jnp.zeros_like(acc_ref)   # |x| >= 0 -> 0 is identity

        @pl.when(p == 0)
        def _():
            xa = jnp.abs(x_ref[...].astype(jnp.float32))
            if needs_mask:
                # Partial last block: OOB rows hold garbage -> mask before max.
                row = lax.broadcasted_iota(jnp.int32, xa.shape, 0) + i * block_rows
                xa = jnp.where(row < rows, xa, jnp.float32(0.0))
            acc_ref[...] = jnp.maximum(acc_ref[...],
                                       jnp.max(xa, axis=0, keepdims=True))

        @pl.when((p == 0) & (i == nb - 1))
        def _():
            max_abs = jnp.max(acc_ref[...])
            loud = params_ref[0, 0]
            apply = params_ref[0, 1]
            scale_ref[0, 0] = jnp.where(apply > 0.5,
                                        loud / (max_abs + jnp.float32(_EPS)),
                                        jnp.float32(1.0))

        @pl.when(p == 1)
        def _():
            # OOB rows of the partial last block are written but discarded.
            o_ref[...] = (x_ref[...].astype(jnp.float32)
                          * scale_ref[0, 0]).astype(o_ref.dtype)

    return kernel


def random_loudness_pallas(waveform: jax.Array, new_loudness, apply=True, *,
                           force_tiled: bool = False) -> jax.Array:
    """out = waveform * (new_loudness / (max|waveform| + 1e-5)) if apply else waveform."""
    orig_shape = waveform.shape
    dtype = waveform.dtype
    n = int(waveform.size)
    itemsize = jnp.dtype(dtype).itemsize

    params = jnp.stack([jnp.asarray(new_loudness, jnp.float32).reshape(()),
                        jnp.asarray(apply, jnp.float32).reshape(())]).reshape(1, 2)

    flat = waveform.reshape(-1)
    padded = False
    if n % _LANE != 0:
        # TODO(synk): rare unaligned-length path still pays a pad + slice copy;
        # zero padding is the identity for max(|x|).
        flat = jnp.pad(flat, (0, _LANE - n % _LANE))
        padded = True
    rows = flat.size // _LANE
    x = flat.reshape(rows, _LANE)          # free view when no padding happened

    if (n * itemsize <= _FUSED_MAX_BYTES) and not force_tiled:
        out = pl.pallas_call(
            _fused_kernel,
            out_shape=jax.ShapeDtypeStruct((rows, _LANE), dtype),
            grid=(1,),
            in_specs=[
                pl.BlockSpec((1, 2), lambda i: (0, 0), memory_space=pltpu.SMEM),
                pl.BlockSpec((rows, _LANE), lambda i: (0, 0)),
            ],
            out_specs=pl.BlockSpec((rows, _LANE), lambda i: (0, 0)),
            compiler_params=pltpu.CompilerParams(
                dimension_semantics=("arbitrary",),
                vmem_limit_bytes=_VMEM_LIMIT,
            ),
            cost_estimate=pl.CostEstimate(flops=2 * n, transcendentals=0,
                                          bytes_accessed=2 * n * itemsize),
        )(params, x)
    else:
        block_rows = min(_BLOCK_ROWS, rows)          # full extent for small slabs
        nb = pl.cdiv(rows, block_rows)
        needs_mask = (rows % block_rows) != 0
        kernel = _make_stream_kernel(rows, block_rows, needs_mask)

        out = pl.pallas_call(
            kernel,
            out_shape=jax.ShapeDtypeStruct((rows, _LANE), dtype),
            grid=(2, nb),                            # phase-major: max, then scale
            in_specs=[
                pl.BlockSpec((1, 2), lambda p, i: (0, 0), memory_space=pltpu.SMEM),
                pl.BlockSpec((block_rows, _LANE), lambda p, i: (i, 0)),
            ],
            # (p*i, 0): stays at block 0 through phase 0 -> nothing is flushed
            # until phase 1 has written real data; traffic stays at 3N.
            out_specs=pl.BlockSpec((block_rows, _LANE), lambda p, i: (p * i, 0)),
            scratch_shapes=[
                pltpu.VMEM((1, _LANE), jnp.float32),   # running column max
                pltpu.SMEM((1, 1), jnp.float32),       # final scalar scale
            ],
            compiler_params=pltpu.CompilerParams(
                dimension_semantics=("arbitrary", "arbitrary"),
                vmem_limit_bytes=_VMEM_LIMIT,
            ),
            cost_estimate=pl.CostEstimate(flops=3 * n, transcendentals=0,
                                          bytes_accessed=3 * n * itemsize),
        )(params, x)

    if padded:
        out = out.reshape(-1)[:n]
    return out.reshape(orig_shape)


def random_loudness(waveform: jax.Array, key: jax.Array,
                    probability: float = 1.0,
                    loudness_range: tuple[float, float] = (0.1, 0.9)) -> jax.Array:
    """Full RandomLoudness semantics; the gate is folded into the kernel scale."""
    k_gate, k_loud = jax.random.split(key)
    lo, hi = loudness_range
    new_loudness = jax.random.uniform(k_loud, (), jnp.float32) * (hi - lo) + lo
    if probability >= 1.0:
        apply = jnp.float32(1.0)         # torch.rand(1) > 1.0 is never true
    else:
        apply = (jax.random.uniform(k_gate, ()) <= probability).astype(jnp.float32)
    return random_loudness_pallas(waveform, new_loudness, apply)


if __name__ == "__main__":
    key = jax.random.PRNGKey(0)
    k_data, k_mod = jax.random.split(key)

    # Small waveform batch: (B, C, T), T a multiple of 128 (no pad copies).
    B, C, T = 2, 1, 4096
    waveform = jax.random.normal(k_data, (B, C, T), dtype=jnp.float32) * 3.0

    out = jax.block_until_ready(random_loudness(waveform, k_mod, probability=1.0))

    # Reference (plain JAX), reproducing the same new_loudness draw.
    _, k_loud = jax.random.split(k_mod)
    lo, hi = 0.1, 0.9
    new_loudness = jax.random.uniform(k_loud, (), jnp.float32) * (hi - lo) + lo
    ref = waveform * (new_loudness / (jnp.max(jnp.abs(waveform)) + 1e-5))

    assert out.shape == waveform.shape and out.dtype == waveform.dtype
    assert jnp.allclose(out, ref, atol=1e-6, rtol=1e-6), "fused path mismatch"

    # Merged streamed path (single block, partial -> exercises tail masking).
    out_tiled = jax.block_until_ready(
        random_loudness_pallas(waveform, new_loudness, True, force_tiled=True))
    assert jnp.allclose(out_tiled, ref, atol=1e-6, rtol=1e-6), "streamed path mismatch"

    # Unaligned length (n % 128 != 0) -> padded fallback path.
    w2 = jax.random.normal(k_data, (1, 1, 5000), dtype=jnp.float32)
    ref2 = w2 * (new_loudness / (jnp.max(jnp.abs(w2)) + 1e-5))
    out2 = jax.block_until_ready(random_loudness_pallas(w2, new_loudness, True))
    assert out2.shape == w2.shape
    assert jnp.allclose(out2, ref2, atol=1e-6, rtol=1e-6), "padded path mismatch"

    # Gate off -> identity (scale folded to 1.0 inside the kernel).
    out_off = jax.block_until_ready(
        random_loudness_pallas(waveform, new_loudness, False))
    assert jnp.allclose(out_off, waveform), "gate-off path mismatch"

    print("KERNEL_OK")
</pallas_src>

<mosaic_0001>
module attributes {stable_mosaic.version = 11 : i64} {
  func.func @_fused_kernel(%arg0: i32, %arg1: memref<1x2xf32, #tpu.memory_space<smem>>, %arg2: memref<64x128xf32, #tpu.memory_space<vmem>>, %arg3: memref<64x128xf32, #tpu.memory_space<vmem>>) attributes {dimension_semantics = [#tpu.dimension_semantics<arbitrary>], iteration_bounds = array<i64: 1>, scalar_prefetch = 0 : i64, scratch_operands = 0 : i64, tpu.core_type = #tpu.core_type<tc>, window_params = [{transform_indices = @transform_0, window_bounds = array<i64: 1, 2>}, {pipeline_mode = #tpu.pipeline_mode<synchronous>, transform_indices = @transform_1, window_bounds = array<i64: 64, 128>}, {pipeline_mode = #tpu.pipeline_mode<synchronous>, transform_indices = @transform_2, window_bounds = array<i64: 64, 128>}]} {
    %c0 = arith.constant 0 : index
    %c0_0 = arith.constant 0 : index
    %0 = vector.load %arg2[%c0, %c0_0] : memref<64x128xf32, #tpu.memory_space<vmem>>, vector<64x128xf32>
    %1 = math.absf %0 : vector<64x128xf32>
    %2 = vector.shape_cast %1 : vector<64x128xf32> to vector<1x64x128xf32>
    %cst = arith.constant dense<0xFF800000> : vector<1xf32>
    %3 = vector.multi_reduction <maximumf>, %2, %cst [1, 2] : vector<1x64x128xf32> to vector<1xf32>
    %4 = vector.shape_cast %3 : vector<1xf32> to vector<1x1x1xf32>
    %5 = vector.extract %4[0, 0, 0] : f32 from vector<1x1x1xf32>
    %c0_1 = arith.constant 0 : index
    %c0_2 = arith.constant 0 : index
    %6 = memref.load %arg1[%c0_1, %c0_2] : memref<1x2xf32, #tpu.memory_space<smem>>
    %c0_3 = arith.constant 0 : index
    %c1 = arith.constant 1 : index
    %7 = memref.load %arg1[%c0_3, %c1] : memref<1x2xf32, #tpu.memory_space<smem>>
    %cst_4 = arith.constant 5.000000e-01 : f32
    %8 = arith.cmpf ogt, %7, %cst_4 : f32
    %cst_5 = arith.constant 9.99999974E-6 : f32
    %9 = arith.addf %5, %cst_5 : f32
    %10 = arith.divf %6, %9 : f32
    %cst_6 = arith.constant 1.000000e+00 : f32
    %11 = arith.select %8, %10, %cst_6 : f32
    %12 = vector.broadcast %11 : f32 to vector<64x128xf32>
    %13 = arith.mulf %0, %12 : vector<64x128xf32>
    %c0_7 = arith.constant 0 : index
    %c0_8 = arith.constant 0 : index
    %14 = vector.load %arg3[%c0_7, %c0_8] : memref<64x128xf32, #tpu.memory_space<vmem>>, vector<64x128xf32>
    tpu.vector_store %arg3[%c0_7, %c0_8], %13 {strides = array<i32>} : memref<64x128xf32, #tpu.memory_space<vmem>>, vector<64x128xf32>,
    return
  }
  func.func @transform_0(%arg0: i32) -> (i32, i32) {
    %c0_i32 = arith.constant 0 : i32
    %c0_i32_0 = arith.constant 0 : i32
    %c0_i32_1 = arith.constant 0 : i32
    return %c0_i32, %c0_i32_0 : i32, i32
  }
  func.func @transform_1(%arg0: i32) -> (i32, i32) {
    %c0_i32 = arith.constant 0 : i32
    %c0_i32_0 = arith.constant 0 : i32
    %c0_i32_1 = arith.constant 0 : i32
    return %c0_i32, %c0_i32_0 : i32, i32
  }
  func.func @transform_2(%arg0: i32) -> (i32, i32) {
    %c0_i32 = arith.constant 0 : i32
    %c0_i32_0 = arith.constant 0 : i32
    %c0_i32_1 = arith.constant 0 : i32
    return %c0_i32, %c0_i32_0 : i32, i32
  }
}

</mosaic_0001>

<bundles_post_ra>
// kernel: tpu_custom_call.1
= control target key start
LH: loop header
LB: loop body
LE: loop exit
PB: predicated region body
PF: predicated region fallthrough
CT: control target
= control target key end

     0   :  { %7 = vsyncpa [#allocation5], 0  ;;  %s252_s0 = inlined_call_operand.hbm [shape: f32[1,2], index: 0, kind: input, shape index: {}]   ;;  %s253_s1 = inlined_call_operand.hbm [shape: f32[64,128], index: 1, kind: input, shape index: {}]   ;;  %s254_s2 = inlined_call_operand.hbm [shape: f32[64,128], index: 2, kind: output, shape index: {}]  }
   0x1   :  { %8 = vsyncpa [#allocation3], 0 }
   0x2   :  { %9 = vsyncpa [#allocation4], 0  ;;  %s125_s11 = scalar_lea.hbm %s252_s0, 16 }
   0x3   :  { %p126_p0 = scmp.ne.s32.totalorder %s252_s0, %s125_s11  ;;  %p129_p1 = scmp.lt.u32.totalorder %s125_s11, %s252_s0 }
   0x5   :  { %p131_p2 = pnand %p129_p1, %p126_p0 }
   0x7   :  { %134 = shalt.err (!%p131_p2)
}
   0x8   :  { %s190_s16 = smov [#allocation2]   ;;  %s191_s19 = smov [#allocation6]  }
   0x9   :  { %17 = dma.hbm_to_smem %s252_s0, 16, %s190_s16, [#allocation5]  }
   0xa   :  { %s23_s20 = sshll.u32 %s191_s19, 4  ;;  %s135_s23 = scalar_lea.hbm %s253_s1, 1024  ;;  %s24_s20 = int_to_ptr.vmem [resolvable:$true] %s23_s20 }
   0xb   :  { %p136_p3 = scmp.ne.s32.totalorder %s253_s1, %s135_s23  ;;  %p139_p4 = scmp.lt.u32.totalorder %s135_s23, %s253_s1 }
   0xd   :  { %p141_p5 = pnand %p139_p4, %p136_p3 }
   0xf   :  { %144 = shalt.err (!%p141_p5)
}
  0x10   :  { %s145_s28 = scalar_lea.vmem %s24_s20, 1024  ;;  %p150_p7 = scmp.lt.s32.totalorder %s24_s20, %s24_s20 }
  0x11   :  { %p146_p6 = scmp.ne.s32.totalorder %s24_s20, %s145_s28  ;;  %p151_p8 = scmp.lt.s32.totalorder %s145_s28, %s145_s28 }
  0x13   :  { %p152_p9 = por %p151_p8, %p150_p7 }
  0x15   :  { %p153_p10 = pnand %p152_p9, %p146_p6 }
  0x17   :  { %156 = shalt.err (!%p153_p10)
}
  0x18   :  { %s192_s0 = smov 128   ;;  %s193_s29 = smov 8  }
  0x19   :  { %29 = dma.hbm_to_vmem [thread:$0]  %s253_s1, 1024, %s24_s20, [#allocation3], %s192_s0, %s192_s0, %s193_s29  }
  0x1a   :  { %179 = dma.done.wait [#allocation5], 16  }
  0x1b   :  { %180 = vsyncadd [#allocation5], 4294967280 }
  0x1c   :  { %181 = dma.done.wait [#allocation3], 1024  }
  0x1d   :  { %182 = vsyncadd [#allocation3], 4294966272 }
  0x1e   :  { %36 = sfence }
  0x1f   :  { %v37_v0 = vld [vmem:[#allocation6] sm:$0xff]  ;;  %v38_v1 = vld [vmem:[#allocation6 + $0x8] sm:$0xff]  ;;  %v39_v2 = vld [vmem:[#allocation6 + $0x10] sm:$0xff]  ;;  %s113_s5 = sld [smem:[#allocation2 + $0x1]]  ;;  %s69_s6 = sld [smem:[#allocation2]] }
  0x20   :  { %v40_v3 = vld [vmem:[#allocation6 + $0x18] sm:$0xff]  ;;  %v41_v4 = vld [vmem:[#allocation6 + $0x20] sm:$0xff]  ;;  %v42_v5 = vld [vmem:[#allocation6 + $0x28] sm:$0xff]  ;;  %s194_s9 = smov [#allocation7]  }
  0x21   :  { %v43_v6 = vld [vmem:[#allocation6 + $0x30] sm:$0xff]  ;;  %v44_v7 = vld [vmem:[#allocation6 + $0x38] sm:$0xff]  ;;  %185 = vmaxabs.init.f32.vacc0 %v37_v0, %v41_v4  ;;  %s100_s10 = sshll.u32 %s194_s9, 4  ;;  %s101_s10 = int_to_ptr.vmem [resolvable:$true] %s100_s10 }
  0x22   :  { %s157_s11 = scalar_lea.vmem %s101_s10, 1024  ;;  %p162_p13 = scmp.lt.s32.totalorder %s101_s10, %s101_s10 }
  0x23   :  { %186 = vmaxabs.f32.vacc0 %v38_v1, %v42_v5  ;;  %p158_p12 = scmp.ne.s32.totalorder %s101_s10, %s157_s11  ;;  %p163_p0 = scmp.lt.s32.totalorder %s157_s11, %s157_s11 }
  0x25   :  { %187 = vmaxabs.f32.vacc0 %v39_v2, %v43_v6  ;;  %p71_p11 = scmp.gt.f32.partialorder %s113_s5, 0.5  ;;  %p164_p1 = por %p163_p0, %p162_p13 }
  0x27   :  { %188 = vmaxabs.f32.vacc0 %v40_v3, %v44_v7  ;;  %p165_p2 = pnand %p164_p1, %p158_p12 }
  0x29   :  { %v189_v8 = vmovacc.low.even.vacc0 }
  0x2b   :  { %60 = vmax.xlane.f32.xlu0 %v189_v8 }
  0xb8   :  { %v61_v9 = vpop.xlane.xlu0 %60 }
  0xb9   :  { %v62_v10 = vrot.slane %v61_v9, 4 }
  0xbb   :  { %v63_v11 = vmax.f32 %v61_v9, %v62_v10 }
  0xbd   :  { %v64_v12 = vrot.slane %v63_v11, 2 }
  0xbf   :  { %v65_v13 = vmax.f32 %v63_v11, %v64_v12 }
  0xc1   :  { %v66_v14 = vrot.slane %v65_v13, 1 }
  0xc3   :  { %v67_v15 = vmax.f32 %v65_v13, %v66_v14 }
  0xc5   :  { %114 = vpush %v67_v15 }
  0xf6   :  { %s115_s1 = spop %114 }
  0xf7   :  { %s72_s4 = sadd.f32 1e-05, %s115_s1 }
  0xf9   :  { %v73_v16 = vstv %s72_s4 }
  0xfa   :  { %123 = vrcp.f32 %v73_v16 }
 0x104   :  { %v124_v17 = vpop.eup %123 }
 0x105   :  { %116 = vpush %v124_v17 }
 0x136   :  { %s117_s7 = spop %116 }
 0x137   :  { %s76_s8 = smul.f32 %s117_s7, %s69_s6 }
 0x139   :  { %s256_s8 = smov (!%p71_p11, %s76_s8), 1.0 }
 0x13a   :  { %v78_v18 = vstv %s256_s8 }
 0x13b   :  { %v79_v19 = vmul.f32 %v78_v18, %v37_v0  ;;  %v80_v20 = vmul.f32 %v78_v18, %v38_v1  ;;  %v81_v21 = vmul.f32 %v78_v18, %v39_v2  ;;  %v82_v22 = vmul.f32 %v78_v18, %v40_v3 }
 0x13c   :  { %v83_v23 = vmul.f32 %v78_v18, %v41_v4  ;;  %v84_v24 = vmul.f32 %v78_v18, %v42_v5  ;;  %v85_v25 = vmul.f32 %v78_v18, %v43_v6  ;;  %v86_v26 = vmul.f32 %v78_v18, %v44_v7 }
 0x13d   :  { %87 = vst [vmem:[#allocation7] sm:$0xff] %v79_v19  ;;  %88 = vst [vmem:[#allocation7 + $0x8] sm:$0xff] %v80_v20 }
 0x13e   :  { %89 = vst [vmem:[#allocation7 + $0x10] sm:$0xff] %v81_v21  ;;  %90 = vst [vmem:[#allocation7 + $0x18] sm:$0xff] %v82_v22 }
 0x13f   :  { %91 = vst [vmem:[#allocation7 + $0x20] sm:$0xff] %v83_v23  ;;  %92 = vst [vmem:[#allocation7 + $0x28] sm:$0xff] %v84_v24 }
 0x140   :  { %93 = vst [vmem:[#allocation7 + $0x30] sm:$0xff] %v85_v25  ;;  %94 = vst [vmem:[#allocation7 + $0x38] sm:$0xff] %v86_v26 }
 0x141   :  { %168 = shalt.err (!%p165_p2)
}
 0x142   :  { %s169_s14 = scalar_lea.hbm %s254_s2, 1024 }
 0x143   :  { %p170_p3 = scmp.ne.s32.totalorder %s254_s2, %s169_s14  ;;  %p173_p4 = scmp.lt.u32.totalorder %s169_s14, %s254_s2 }
 0x145   :  { %p175_p5 = pnand %p173_p4, %p170_p3 }
 0x147   :  { %178 = shalt.err (!%p175_p5)
}
 0x148   :  { %106 = dma.vmem_to_hbm [thread:$0]  %s101_s10, 1024, %s254_s2, [#allocation4], %s192_s0, %s192_s0, %s193_s29  }
 0x149   :  { %183 = dma.done.wait [#allocation4], 1024  }
 0x14a   :  { %184 = vsyncadd [#allocation4], 4294966272 }
 0x14b   :  { %110 = vsyncpa [#allocation3], 1 }
 0x14c   :  { %111 = vsyncpa [#allocation4], 1 }
 0x14d   :  { %112 = vsyncpa [#allocation5], 1 }

</bundles_post_ra>
